<compile_context>
chip_gen: v7x
topology: tpu7x:2x2x1
jax: 0.10.0
libtpu: 0.0.40
codegen_flags: <defaults>
</compile_context>

<pallas_src>
import math
import functools

import jax
import jax.numpy as jnp
import numpy as np
from jax.experimental import pallas as pl
from jax.experimental.pallas import tpu as pltpu


def _mha_kernel(q_ref, k_ref, v_ref, wqkv_ref, bqkv_ref, wo_ref, bo_ref,
                out_ref, *opt_refs,
                num_heads, head_dim, compute_dtype, need_weights):
    """One (batch, L-tile) per grid step."""
    H, hd = num_heads, head_dim
    E = H * hd
    cdt = compute_dtype

    qx = q_ref[0].astype(cdt)          # (TL, E)
    kx = k_ref[0].astype(cdt)          # (S,  E)
    vx = v_ref[0].astype(cdt)          # (S,  E)
    TL = qx.shape[0]
    S = kx.shape[0]

    # Full-width input projections: every matmul fills E output lanes and
    # accumulates in f32.  Scaling (1/sqrt(hd)) is pre-folded into the Q
    # columns of wqkv / bqkv by the wrapper.
    q = jnp.dot(qx, wqkv_ref[:, 0:E].astype(cdt),
                preferred_element_type=jnp.float32) + bqkv_ref[:, 0:E].astype(jnp.float32)
    k = jnp.dot(kx, wqkv_ref[:, E:2 * E].astype(cdt),
                preferred_element_type=jnp.float32) + bqkv_ref[:, E:2 * E].astype(jnp.float32)
    v = jnp.dot(vx, wqkv_ref[:, 2 * E:3 * E].astype(cdt),
                preferred_element_type=jnp.float32) + bqkv_ref[:, 2 * E:3 * E].astype(jnp.float32)

    # Head split: (rows, E) -> (H, rows, hd).  One relayout per operand.
    qh = jnp.transpose(q.reshape(TL, H, hd), (1, 0, 2)).astype(cdt)
    kh = jnp.transpose(k.reshape(S, H, hd), (1, 0, 2)).astype(cdt)
    vh = jnp.transpose(v.reshape(S, H, hd), (1, 0, 2)).astype(cdt)

    # Scores + numerically stable softmax, all in f32 (exp on the EUP).
    # Exact normalization: the weights are a user-visible output, so no
    # approx reciprocal here.
    s = jnp.einsum('hld,hsd->hls', qh, kh, preferred_element_type=jnp.float32)
    s = s - jnp.max(s, axis=-1, keepdims=True)
    p = jnp.exp(s)
    p = p * (1.0 / jnp.sum(p, axis=-1, keepdims=True))

    # Weighted values, merge heads, single full-width output projection
    # (contraction K = E on the MXU).
    o = jnp.einsum('hls,hsd->hld', p.astype(cdt), vh,
                   preferred_element_type=jnp.float32)          # (H, TL, hd) f32
    om = jnp.transpose(o, (1, 0, 2)).reshape(TL, E).astype(cdt)  # (TL, E)
    out = jnp.dot(om, wo_ref[...].astype(cdt),
                  preferred_element_type=jnp.float32) + bo_ref[...].astype(jnp.float32)

    out_ref[0] = out.astype(out_ref.dtype)
    if need_weights:
        attnw_ref = opt_refs[0]
        attnw_ref[0] = (jnp.sum(p, axis=0) * (1.0 / H)).astype(attnw_ref.dtype)


def multihead_attention_pallas(query, key, value, params, num_heads, *,
                               need_weights=True, compute_dtype=jnp.float32):
    """query: (L, N, E), key/value: (S, N, E).
    Returns (attn_output (L, N, E), attn_output_weights (N, L, S) or None).
    compute_dtype=jnp.bfloat16 is recommended for the MXU operands on v6e/v7x."""
    L, N, E = query.shape
    S = key.shape[0]
    head_dim = E // num_heads
    assert head_dim * num_heads == E
    scaling = float(head_dim) ** (-0.5)

    W = params["in_proj_weight"]        # (3E, E)
    b = params["in_proj_bias"]          # (3E,)
    Wo = params["out_proj_weight"]      # (E, E)
    bo = params["out_proj_bias"]        # (E,)

    # Stacked, pre-transposed QKV weight (E, 3E) with scaling folded into the
    # Q columns; single stacked bias (1, 3E).
    col_scale = jnp.concatenate([jnp.full((E,), scaling, W.dtype),
                                 jnp.ones((2 * E,), W.dtype)])
    wqkv = jnp.transpose(W) * col_scale[None, :]                  # (E, 3E)
    bqkv = (b * col_scale).reshape(1, 3 * E)
    wo = jnp.transpose(Wo)                                        # (E, E)
    bo2 = bo.reshape(1, E)

    # Batch-major activations so each per-batch block's last two dims equal
    # the full (L/S, E) array dims (legal (8,128) tiling for any N).
    q_nle = jnp.transpose(query, (1, 0, 2))                       # (N, L, E)
    k_nse = jnp.transpose(key, (1, 0, 2))                         # (N, S, E)
    v_nse = jnp.transpose(value, (1, 0, 2))                       # (N, S, E)

    # L tiling: second parallel grid axis (bounds VMEM, fills both v7x TCs).
    TL = 128 if (L > 128 and L % 128 == 0) else L
    n_lt = L // TL

    kernel = functools.partial(_mha_kernel, num_heads=num_heads,
                               head_dim=head_dim, compute_dtype=compute_dtype,
                               need_weights=need_weights)

    out_shapes = [jax.ShapeDtypeStruct((N, L, E), query.dtype)]
    out_specs = [pl.BlockSpec((1, TL, E), lambda bi, lt: (bi, lt, 0))]
    if need_weights:
        out_shapes.append(jax.ShapeDtypeStruct((N, L, S), query.dtype))
        out_specs.append(pl.BlockSpec((1, TL, S), lambda bi, lt: (bi, lt, 0)))

    # Rough per-step VMEM budget: double-buffered in/out blocks + resident
    # weights + live f32 intermediates; clamp to [32 MiB default, 64 MiB v7x].
    itb = 4
    est = (2 * (TL * E + 2 * S * E) * itb
           + 2 * (TL * E + (TL * S if need_weights else 0)) * itb
           + (3 * E * E + E * E + 4 * E) * itb
           + (3 * max(TL, S) * E + 3 * num_heads * TL * S
              + 3 * num_heads * max(TL, S) * head_dim) * itb)
    vmem_limit = int(min(64 << 20, max(32 << 20, 2 * est)))

    outs = pl.pallas_call(
        kernel,
        out_shape=tuple(out_shapes),
        grid_spec=pltpu.PrefetchScalarGridSpec(
            num_scalar_prefetch=0,
            grid=(N, n_lt),
            in_specs=[
                pl.BlockSpec((1, TL, E), lambda bi, lt: (bi, lt, 0)),   # query
                pl.BlockSpec((1, S, E), lambda bi, lt: (bi, 0, 0)),     # key
                pl.BlockSpec((1, S, E), lambda bi, lt: (bi, 0, 0)),     # value
                pl.BlockSpec((E, 3 * E), lambda bi, lt: (0, 0)),        # Wqkv^T (scaled)
                pl.BlockSpec((1, 3 * E), lambda bi, lt: (0, 0)),        # bqkv (scaled)
                pl.BlockSpec((E, E), lambda bi, lt: (0, 0)),            # Wo^T
                pl.BlockSpec((1, E), lambda bi, lt: (0, 0)),            # bo
            ],
            out_specs=tuple(out_specs),
        ),
        compiler_params=pltpu.CompilerParams(
            dimension_semantics=("parallel", "parallel"),
            vmem_limit_bytes=vmem_limit),
    )(q_nle, k_nse, v_nse, wqkv, bqkv, wo, bo2)

    out_nle = outs[0]
    attnw = outs[1] if need_weights else None
    attn_output = jnp.transpose(out_nle, (1, 0, 2))   # (L, N, E)
    return attn_output, attnw


def _reference_mha(query, key, value, params, num_heads):
    """Pure-JAX reference: the separate-projection path of
    multi_head_attention_forward (what the module runs for distinct q/k/v;
    identical to the fused qkv_same path when q==k==v)."""
    L, N, E = query.shape
    S = key.shape[0]
    hd = E // num_heads
    scaling = float(hd) ** (-0.5)
    W = params["in_proj_weight"]
    b = params["in_proj_bias"]
    q = jnp.einsum("lne,fe->lnf", query, W[0:E]) + b[0:E]
    k = jnp.einsum("sne,fe->snf", key, W[E:2 * E]) + b[E:2 * E]
    v = jnp.einsum("sne,fe->snf", value, W[2 * E:]) + b[2 * E:]
    q = q * scaling
    q = q.reshape(L, N * num_heads, hd).transpose(1, 0, 2)
    k = k.reshape(S, N * num_heads, hd).transpose(1, 0, 2)
    v = v.reshape(S, N * num_heads, hd).transpose(1, 0, 2)
    w = jnp.einsum("blh,bsh->bls", q, k)
    w = jax.nn.softmax(w, axis=-1)
    o = jnp.einsum("bls,bsh->blh", w, v)
    o = o.transpose(1, 0, 2).reshape(L, N, E)
    o = jnp.einsum("lne,fe->lnf", o, params["out_proj_weight"]) + params["out_proj_bias"]
    w = w.reshape(N, num_heads, L, S).sum(axis=1) / num_heads
    return o, w


def _xavier_uniform(key, shape):
    fan_out, fan_in = shape
    a = math.sqrt(6.0 / (fan_in + fan_out))
    return jax.random.uniform(key, shape, jnp.float32, -a, a)


if __name__ == "__main__":
    # Small shapes consistent with the module: L=8, S=8, N=2, E=32, heads=4.
    L, S, N, E, H = 8, 8, 2, 32, 4
    root = jax.random.PRNGKey(0)
    k_q, k_k, k_v, k_w1, k_w2, k_b1, k_b2 = jax.random.split(root, 7)

    query = jax.random.normal(k_q, (L, N, E), jnp.float32)
    key = jax.random.normal(k_k, (S, N, E), jnp.float32)
    value = jax.random.normal(k_v, (S, N, E), jnp.float32)

    params = {
        "in_proj_weight": _xavier_uniform(k_w1, (3 * E, E)),
        "in_proj_bias": 0.1 * jax.random.normal(k_b1, (3 * E,), jnp.float32),
        "out_proj_weight": _xavier_uniform(k_w2, (E, E)),
        "out_proj_bias": 0.1 * jax.random.normal(k_b2, (E,), jnp.float32),
    }

    ref_out, ref_w = _reference_mha(query, key, value, params, H)

    # f32 path (exact softmax normalization).
    attn_out, attn_w = multihead_attention_pallas(query, key, value, params, H,
                                                  compute_dtype=jnp.float32)
    jax.block_until_ready((attn_out, attn_w))
    np.testing.assert_allclose(np.asarray(attn_out), np.asarray(ref_out),
                               rtol=1e-3, atol=1e-3)
    np.testing.assert_allclose(np.asarray(attn_w), np.asarray(ref_w),
                               rtol=1e-3, atol=1e-3)

    # need_weights=False fast path (skips the (N,L,S) writeback entirely).
    attn_out_nw, attn_w_nw = multihead_attention_pallas(
        query, key, value, params, H, need_weights=False,
        compute_dtype=jnp.float32)
    jax.block_until_ready(attn_out_nw)
    assert attn_w_nw is None
    np.testing.assert_allclose(np.asarray(attn_out_nw), np.asarray(ref_out),
                               rtol=1e-3, atol=1e-3)

    # bf16 MXU-operand path (recommended default for v6e/v7x); loose tolerance.
    attn_out_bf, attn_w_bf = multihead_attention_pallas(query, key, value, params, H,
                                                        compute_dtype=jnp.bfloat16)
    jax.block_until_ready((attn_out_bf, attn_w_bf))
    np.testing.assert_allclose(np.asarray(attn_out_bf), np.asarray(ref_out),
                               rtol=5e-2, atol=5e-2)
    np.testing.assert_allclose(np.asarray(attn_w_bf), np.asarray(ref_w),
                               rtol=5e-2, atol=5e-2)

    print("KERNEL_OK")
</pallas_src>

<mosaic_0001>
module attributes {stable_mosaic.version = 11 : i64} {
  func.func @_mha_kernel(%arg0: i32, %arg1: i32, %arg2: memref<1x8x32xf32, #tpu.memory_space<vmem>>, %arg3: memref<1x8x32xf32, #tpu.memory_space<vmem>>, %arg4: memref<1x8x32xf32, #tpu.memory_space<vmem>>, %arg5: memref<32x96xf32, #tpu.memory_space<vmem>>, %arg6: memref<1x96xf32, #tpu.memory_space<vmem>>, %arg7: memref<32x32xf32, #tpu.memory_space<vmem>>, %arg8: memref<1x32xf32, #tpu.memory_space<vmem>>, %arg9: memref<1x8x32xf32, #tpu.memory_space<vmem>>, %arg10: memref<1x8x8xf32, #tpu.memory_space<vmem>>) attributes {dimension_semantics = [#tpu.dimension_semantics<parallel>, #tpu.dimension_semantics<parallel>], iteration_bounds = array<i64: 2, 1>, scalar_prefetch = 0 : i64, scratch_operands = 0 : i64, tpu.core_type = #tpu.core_type<tc>, window_params = [{transform_indices = @transform_0, window_bounds = array<i64: 1, 8, 32>}, {transform_indices = @transform_1, window_bounds = array<i64: 1, 8, 32>}, {transform_indices = @transform_2, window_bounds = array<i64: 1, 8, 32>}, {pipeline_mode = #tpu.pipeline_mode<synchronous>, transform_indices = @transform_3, window_bounds = array<i64: 32, 96>}, {pipeline_mode = #tpu.pipeline_mode<synchronous>, transform_indices = @transform_4, window_bounds = array<i64: 1, 96>}, {pipeline_mode = #tpu.pipeline_mode<synchronous>, transform_indices = @transform_5, window_bounds = array<i64: 32, 32>}, {pipeline_mode = #tpu.pipeline_mode<synchronous>, transform_indices = @transform_6, window_bounds = array<i64: 1, 32>}, {transform_indices = @transform_7, window_bounds = array<i64: 1, 8, 32>}, {transform_indices = @transform_8, window_bounds = array<i64: 1, 8, 8>}]} {
    %c0 = arith.constant 0 : index
    %c0_0 = arith.constant 0 : index
    %c0_1 = arith.constant 0 : index
    %0 = vector.load %arg2[%c0, %c0_0, %c0_1] : memref<1x8x32xf32, #tpu.memory_space<vmem>>, vector<1x8x32xf32>
    %1 = vector.shape_cast %0 : vector<1x8x32xf32> to vector<8x32xf32>
    %c0_2 = arith.constant 0 : index
    %c0_3 = arith.constant 0 : index
    %c0_4 = arith.constant 0 : index
    %2 = vector.load %arg3[%c0_2, %c0_3, %c0_4] : memref<1x8x32xf32, #tpu.memory_space<vmem>>, vector<1x8x32xf32>
    %3 = vector.shape_cast %2 : vector<1x8x32xf32> to vector<8x32xf32>
    %c0_5 = arith.constant 0 : index
    %c0_6 = arith.constant 0 : index
    %c0_7 = arith.constant 0 : index
    %4 = vector.load %arg4[%c0_5, %c0_6, %c0_7] : memref<1x8x32xf32, #tpu.memory_space<vmem>>, vector<1x8x32xf32>
    %5 = vector.shape_cast %4 : vector<1x8x32xf32> to vector<8x32xf32>
    %c0_8 = arith.constant 0 : index
    %c0_9 = arith.constant 0 : index
    %6 = vector.load %arg5[%c0_8, %c0_9] : memref<32x96xf32, #tpu.memory_space<vmem>>, vector<32x32xf32>
    %cst = arith.constant dense<0.000000e+00> : vector<8x32xf32>
    %7 = tpu.matmul %1, %6, %cst {dimension_numbers = #tpu.dot_dimension_numbers<[1], [0], [0], [1], [0, 0, 1, 1], [], []>} : vector<8x32xf32>, vector<32x32xf32>, vector<8x32xf32> -> vector<8x32xf32>
    %c0_10 = arith.constant 0 : index
    %c0_11 = arith.constant 0 : index
    %8 = vector.load %arg6[%c0_10, %c0_11] : memref<1x96xf32, #tpu.memory_space<vmem>>, vector<1x32xf32>
    %9 = vector.broadcast %8 : vector<1x32xf32> to vector<8x32xf32>
    %10 = arith.addf %7, %9 : vector<8x32xf32>
    %c0_12 = arith.constant 0 : index
    %c32 = arith.constant 32 : index
    %11 = vector.load %arg5[%c0_12, %c32] : memref<32x96xf32, #tpu.memory_space<vmem>>, vector<32x32xf32>
    %cst_13 = arith.constant dense<0.000000e+00> : vector<8x32xf32>
    %12 = tpu.matmul %3, %11, %cst_13 {dimension_numbers = #tpu.dot_dimension_numbers<[1], [0], [0], [1], [0, 0, 1, 1], [], []>} : vector<8x32xf32>, vector<32x32xf32>, vector<8x32xf32> -> vector<8x32xf32>
    %c0_14 = arith.constant 0 : index
    %c32_15 = arith.constant 32 : index
    %13 = vector.load %arg6[%c0_14, %c32_15] : memref<1x96xf32, #tpu.memory_space<vmem>>, vector<1x32xf32>
    %14 = vector.broadcast %13 : vector<1x32xf32> to vector<8x32xf32>
    %15 = arith.addf %12, %14 : vector<8x32xf32>
    %c0_16 = arith.constant 0 : index
    %c64 = arith.constant 64 : index
    %16 = vector.load %arg5[%c0_16, %c64] : memref<32x96xf32, #tpu.memory_space<vmem>>, vector<32x32xf32>
    %cst_17 = arith.constant dense<0.000000e+00> : vector<8x32xf32>
    %17 = tpu.matmul %5, %16, %cst_17 {dimension_numbers = #tpu.dot_dimension_numbers<[1], [0], [0], [1], [0, 0, 1, 1], [], []>} : vector<8x32xf32>, vector<32x32xf32>, vector<8x32xf32> -> vector<8x32xf32>
    %c0_18 = arith.constant 0 : index
    %c64_19 = arith.constant 64 : index
    %18 = vector.load %arg6[%c0_18, %c64_19] : memref<1x96xf32, #tpu.memory_space<vmem>>, vector<1x32xf32>
    %19 = vector.broadcast %18 : vector<1x32xf32> to vector<8x32xf32>
    %20 = arith.addf %17, %19 : vector<8x32xf32>
    %21 = vector.shape_cast %10 : vector<8x32xf32> to vector<8x4x8xf32>
    %22 = tpu.transpose %21, [1, 0, 2] : vector<8x4x8xf32> -> vector<4x8x8xf32>
    %23 = vector.shape_cast %15 : vector<8x32xf32> to vector<8x4x8xf32>
    %24 = tpu.transpose %23, [1, 0, 2] : vector<8x4x8xf32> -> vector<4x8x8xf32>
    %25 = vector.shape_cast %20 : vector<8x32xf32> to vector<8x4x8xf32>
    %26 = tpu.transpose %25, [1, 0, 2] : vector<8x4x8xf32> -> vector<4x8x8xf32>
    "tpu.trace_start"() <{level = 10 : i32, message = "hld,hsd->hls"}> : () -> ()
    %cst_20 = arith.constant dense<0.000000e+00> : vector<4x8x8xf32>
    %27 = tpu.matmul %22, %24, %cst_20 {dimension_numbers = #tpu.dot_dimension_numbers<[2], [2], [1], [1], [0, 0, 0, 1, 1, 1], [0], [0]>} : vector<4x8x8xf32>, vector<4x8x8xf32>, vector<4x8x8xf32> -> vector<4x8x8xf32>
    "tpu.trace_stop"() : () -> ()
    %cst_21 = arith.constant dense<0xFF800000> : vector<4x8xf32>
    %28 = vector.multi_reduction <maximumf>, %27, %cst_21 [2] : vector<4x8x8xf32> to vector<4x8xf32>
    %29 = vector.shape_cast %28 : vector<4x8xf32> to vector<4x8x1xf32>
    %30 = vector.broadcast %29 : vector<4x8x1xf32> to vector<4x8x8xf32>
    %31 = arith.subf %27, %30 : vector<4x8x8xf32>
    %32 = math.exp %31 : vector<4x8x8xf32>
    %cst_22 = arith.constant dense<0.000000e+00> : vector<4x8xf32>
    %33 = vector.multi_reduction <add>, %32, %cst_22 [2] : vector<4x8x8xf32> to vector<4x8xf32>
    %34 = vector.shape_cast %33 : vector<4x8xf32> to vector<4x8x1xf32>
    %cst_23 = arith.constant 1.000000e+00 : f32
    %35 = vector.broadcast %cst_23 : f32 to vector<4x8x1xf32>
    %36 = arith.divf %35, %34 : vector<4x8x1xf32>
    %37 = vector.broadcast %36 : vector<4x8x1xf32> to vector<4x8x8xf32>
    %38 = arith.mulf %32, %37 : vector<4x8x8xf32>
    "tpu.trace_start"() <{level = 10 : i32, message = "hls,hsd->hld"}> : () -> ()
    %cst_24 = arith.constant dense<0.000000e+00> : vector<4x8x8xf32>
    %39 = tpu.matmul %38, %26, %cst_24 {dimension_numbers = #tpu.dot_dimension_numbers<[2], [1], [1], [2], [0, 0, 0, 1, 1, 2], [0], [0]>} : vector<4x8x8xf32>, vector<4x8x8xf32>, vector<4x8x8xf32> -> vector<4x8x8xf32>
    "tpu.trace_stop"() : () -> ()
    %40 = tpu.transpose %39, [1, 0, 2] : vector<4x8x8xf32> -> vector<8x4x8xf32>
    %41 = vector.shape_cast %40 : vector<8x4x8xf32> to vector<8x32xf32>
    %c0_25 = arith.constant 0 : index
    %c0_26 = arith.constant 0 : index
    %42 = vector.load %arg7[%c0_25, %c0_26] : memref<32x32xf32, #tpu.memory_space<vmem>>, vector<32x32xf32>
    %cst_27 = arith.constant dense<0.000000e+00> : vector<8x32xf32>
    %43 = tpu.matmul %41, %42, %cst_27 {dimension_numbers = #tpu.dot_dimension_numbers<[1], [0], [0], [1], [0, 0, 1, 1], [], []>} : vector<8x32xf32>, vector<32x32xf32>, vector<8x32xf32> -> vector<8x32xf32>
    %c0_28 = arith.constant 0 : index
    %c0_29 = arith.constant 0 : index
    %44 = vector.load %arg8[%c0_28, %c0_29] : memref<1x32xf32, #tpu.memory_space<vmem>>, vector<1x32xf32>
    %45 = vector.broadcast %44 : vector<1x32xf32> to vector<8x32xf32>
    %46 = arith.addf %43, %45 : vector<8x32xf32>
    %c0_30 = arith.constant 0 : index
    %c0_31 = arith.constant 0 : index
    %c0_32 = arith.constant 0 : index
    %47 = vector.load %arg9[%c0_30, %c0_31, %c0_32] : memref<1x8x32xf32, #tpu.memory_space<vmem>>, vector<1x8x32xf32>
    %48 = vector.shape_cast %47 : vector<1x8x32xf32> to vector<8x32xf32>
    %49 = vector.shape_cast %46 : vector<8x32xf32> to vector<1x8x32xf32>
    tpu.vector_store %arg9[%c0_30, %c0_31, %c0_32], %49 {strides = array<i32>} : memref<1x8x32xf32, #tpu.memory_space<vmem>>, vector<1x8x32xf32>,
    %cst_33 = arith.constant dense<0.000000e+00> : vector<8x8xf32>
    %50 = vector.multi_reduction <add>, %38, %cst_33 [0] : vector<4x8x8xf32> to vector<8x8xf32>
    %cst_34 = arith.constant 2.500000e-01 : f32
    %51 = vector.broadcast %cst_34 : f32 to vector<8x8xf32>
    %52 = arith.mulf %50, %51 : vector<8x8xf32>
    %c0_35 = arith.constant 0 : index
    %c0_36 = arith.constant 0 : index
    %c0_37 = arith.constant 0 : index
    %53 = vector.load %arg10[%c0_35, %c0_36, %c0_37] : memref<1x8x8xf32, #tpu.memory_space<vmem>>, vector<1x8x8xf32>
    %54 = vector.shape_cast %53 : vector<1x8x8xf32> to vector<8x8xf32>
    %55 = vector.shape_cast %52 : vector<8x8xf32> to vector<1x8x8xf32>
    tpu.vector_store %arg10[%c0_35, %c0_36, %c0_37], %55 {strides = array<i32>} : memref<1x8x8xf32, #tpu.memory_space<vmem>>, vector<1x8x8xf32>,
    return
  }
  func.func @transform_0(%arg0: i32, %arg1: i32) -> (i32, i32, i32) {
    %c0_i32 = arith.constant 0 : i32
    %c0_i32_0 = arith.constant 0 : i32
    return %arg0, %arg1, %c0_i32 : i32, i32, i32
  }
  func.func @transform_1(%arg0: i32, %arg1: i32) -> (i32, i32, i32) {
    %c0_i32 = arith.constant 0 : i32
    %c0_i32_0 = arith.constant 0 : i32
    %c0_i32_1 = arith.constant 0 : i32
    return %arg0, %c0_i32, %c0_i32_0 : i32, i32, i32
  }
  func.func @transform_2(%arg0: i32, %arg1: i32) -> (i32, i32, i32) {
    %c0_i32 = arith.constant 0 : i32
    %c0_i32_0 = arith.constant 0 : i32
    %c0_i32_1 = arith.constant 0 : i32
    return %arg0, %c0_i32, %c0_i32_0 : i32, i32, i32
  }
  func.func @transform_3(%arg0: i32, %arg1: i32) -> (i32, i32) {
    %c0_i32 = arith.constant 0 : i32
    %c0_i32_0 = arith.constant 0 : i32
    %c0_i32_1 = arith.constant 0 : i32
    return %c0_i32, %c0_i32_0 : i32, i32
  }
  func.func @transform_4(%arg0: i32, %arg1: i32) -> (i32, i32) {
    %c0_i32 = arith.constant 0 : i32
    %c0_i32_0 = arith.constant 0 : i32
    %c0_i32_1 = arith.constant 0 : i32
    return %c0_i32, %c0_i32_0 : i32, i32
  }
  func.func @transform_5(%arg0: i32, %arg1: i32) -> (i32, i32) {
    %c0_i32 = arith.constant 0 : i32
    %c0_i32_0 = arith.constant 0 : i32
    %c0_i32_1 = arith.constant 0 : i32
    return %c0_i32, %c0_i32_0 : i32, i32
  }
  func.func @transform_6(%arg0: i32, %arg1: i32) -> (i32, i32) {
    %c0_i32 = arith.constant 0 : i32
    %c0_i32_0 = arith.constant 0 : i32
    %c0_i32_1 = arith.constant 0 : i32
    return %c0_i32, %c0_i32_0 : i32, i32
  }
  func.func @transform_7(%arg0: i32, %arg1: i32) -> (i32, i32, i32) {
    %c0_i32 = arith.constant 0 : i32
    %c0_i32_0 = arith.constant 0 : i32
    return %arg0, %arg1, %c0_i32 : i32, i32, i32
  }
  func.func @transform_8(%arg0: i32, %arg1: i32) -> (i32, i32, i32) {
    %c0_i32 = arith.constant 0 : i32
    %c0_i32_0 = arith.constant 0 : i32
    return %arg0, %arg1, %c0_i32 : i32, i32, i32
  }
}

</mosaic_0001>

<bundles_post_ra>
// kernel: tpu_custom_call.1
= control target key start
LH: loop header
LB: loop body
LE: loop exit
PB: predicated region body
PF: predicated region fallthrough
CT: control target
= control target key end

     0   :  { %s3461_s0 = inlined_call_operand.hbm [shape: f32[2,8,32], index: 0, kind: input, shape index: {}]   ;;  %s3462_s1 = inlined_call_operand.hbm [shape: f32[2,8,32], index: 1, kind: input, shape index: {}]   ;;  %s3463_s2 = inlined_call_operand.hbm [shape: f32[2,8,32], index: 2, kind: input, shape index: {}]   ;;  %s3464_s3 = inlined_call_operand.hbm [shape: f32[32,96], index: 3, kind: input, shape index: {}]   ;;  %s3465_s4 = inlined_call_operand.vmem [shape: f32[1,96], index: 4, kind: input, shape index: {}]   ;;  %s3466_s5 = inlined_call_operand.hbm [shape: f32[32,32], index: 5, kind: input, shape index: {}]   ;;  %s3467_s6 = inlined_call_operand.vmem [shape: f32[1,32], index: 6, kind: input, shape index: {}]   ;;  %s3468_s7 = inlined_call_operand.hbm [shape: f32[2,8,32], index: 7, kind: output, shape index: {0}]   ;;  %s3469_s8 = inlined_call_operand.hbm [shape: f32[2,8,8], index: 8, kind: output, shape index: {1}]  }
   0x1   :  { %3490 = sst [smem:[#allocation25_spill]] %s3462_s1 }
   0x2   :  { %3491 = sst [smem:[#allocation26_spill]] %s3464_s3 }
   0x3   :  { %3492 = sst [smem:[#allocation27_spill]] %s3466_s5 }
   0x4   :  { %14 = vsyncpa [#allocation3], 0 }
   0x5   :  { %16 = vsyncpa [#allocation3 + $0x1], 0 }
   0x6   :  { %17 = vsyncpa [#allocation6], 0 }
   0x7   :  { %19 = vsyncpa [#allocation6 + $0x1], 0 }
   0x8   :  { %20 = vsyncpa [#allocation9], 0 }
   0x9   :  { %21 = vsyncpa [#allocation4], 0 }
   0xa   :  { %23 = vsyncpa [#allocation4 + $0x1], 0 }
   0xb   :  { %24 = vsyncpa [#allocation13], 0 }
   0xc   :  { %26 = vsyncpa [#allocation13 + $0x1], 0  ;;  %s2940_s27 = smov 0   ;;  %s2942_s28 = smov 0  }
   0xd   :  { %s2944_s29 = smov 0   ;;  %s2946_s30 = smov 0  }
   0xe   :  { %s2948_s9 = smov 0   ;;  %s2950_s10 = smov 0  }
   0xf LB: > { %3493 = sst [smem:[#allocation19_spill]] %s2851_s27  ;;  %s2971_s11 = sadd.s32 4294967295, %s2871_s10   ;;  %s2871_s10 = sphi %s2950_s10, %s32_s10   ;;  %s2867_s9 = sphi %s2948_s9, %s3531_s9   ;;  %s2863_s30 = sphi %s2946_s30, %s3530_s30   ;;  %s2859_s29 = sphi %s2944_s29, %s3534_s29   ;;  %s2855_s28 = sphi %s2942_s28, %s3533_s28   ;;  %s2851_s27 = sphi %s2940_s27, %s3532_s27  }
  0x10   : > { %3494 = sst [smem:[#allocation20_spill]] %s2867_s9  ;;  %s2259_s12 = sadd.s32 4294967294, %s2871_s10  }
  0x11   : > { %3495 = sst [smem:[#allocation21_spill]] %s2871_s10  ;;  %p66_p0 = scmp.ne.s32.totalorder %s2855_s28, %s2851_s27 }
  0x12   : > { %p3470_p1 = scmp.eq.s32.totalorder %s2971_s11, 0  ;;  %p234_p3 = scmp.eq.s32.totalorder %s2259_s12, 1 }
  0x13   : > { %p2260_p5 = scmp.ge.s32.totalorder %s2871_s10, 1  ;;  %p269_p7 = scmp.lt.s32.totalorder %s2871_s10, 3 }
  0x14   : > { %p2980_p4 = por %p3470_p1, %p66_p0  ;;  %p2985_p6 = por %p234_p3, %p66_p0 }
  0x15   : > { %p2990_p8 = pnand %p2260_p5, %p269_p7  ;;  %s2873_s16 = smov [#allocation8]  }
  0x16   : > { %s3496_s13 = scalar_select %p2980_p4, 1, 0 }
  0x17   : > { %s3497_s14 = scalar_select %p2985_p6, 1, 0 }
  0x18   : > { %s3499_s15 = scalar_select %p2990_p8, 1, 0 }
  0x19   : > { %3498 = sst [smem:[#allocation22_spill]] %s3497_s14  ;;  %s281_s17 = sshll.u32 %s2873_s16, 4  ;;  %s282_s17 = int_to_ptr.vmem [resolvable:$true] %s281_s17 }
  0x1a   : > { %p2472_p9 = pneg %p2990_p8  ;;  %s44_s19 = sadd.s32 1, %s2867_s9 }
  0x1b   : > { %s3501_s3 = sld [smem:[#allocation26_spill]] }
  0x1c   : > { %p2999_p11 = pnand %p2472_p9, %p3470_p1 }
  0x1e   : > { %s3500_s18 = scalar_select %p2999_p11, 1, 0 }
  0x1f   : > { %p3482_p13 = pneg %p2999_p11 }
  0x21   : > { %s2603_s22 = scalar_lea.hbm %s3501_s3, 512 }
  0x22   : > { %p2604_p12 = scmp.ne.s32.totalorder %s3501_s3, %s2603_s22  ;;  %p2610_p5 = scmp.lt.u32.totalorder %s2603_s22, %s3501_s3 }
  0x24   : > { %p2606_p0 = pnand %p3482_p13, %p2604_p12 }
  0x26   : > { %p2607_p3 = pneg %p2606_p0 }
  0x28   : > { %p2612_p7 = pnand %p2610_p5, %p2607_p3 }
  0x2a   : > { %2615 = shalt.err (!%p2612_p7)
}
  0x2b   : > { %s2616_s12 = scalar_lea.vmem %s282_s17, 512  ;;  %p2624_p2 = scmp.lt.s32.totalorder %s282_s17, %s282_s17 }
  0x2c   : > { %p2617_p9 = scmp.ne.s32.totalorder %s282_s17, %s2616_s12  ;;  %p2625_p6 = scmp.lt.s32.totalorder %s2616_s12, %s2616_s12 }
  0x2e   : > { %p2619_p10 = pnand %p2617_p9, %p3482_p13  ;;  %p2626_p4 = por %p2625_p6, %p2624_p2 }
  0x30   : > { %p2620_p1 = pneg %p2619_p10 }
  0x32   : > { %p2627_p8 = pnand %p2626_p4, %p2620_p1 }
  0x34   : > { %2630 = shalt.err (!%p2627_p8)
}
  0x35   : > { %s3473_s16 = smov 128   ;;  %s3474_s20 = smov 8  }
  0x36   : > { %2475 = dma.hbm_to_vmem [thread:$0]  (!%p2999_p11), %s3501_s3, 512, %s282_s17, [#allocation9], %s3473_s16, %s3473_s16, %s3474_s20  }
  0x37   : > { %p46_p1 = scmp.ge.s32.totalorder %s44_s19, 2  ;;  %s53_s23 = sadd.s32 1, %s2859_s29 }
  0x38   : > { %p60_p2 = scmp.ne.s32.totalorder %s2859_s29, %s2855_s28  ;;  %p61_p4 = scmp.eq.s32.totalorder %s2871_s10, 0 }
  0x39   : > { %s3536_s19 = smov (%p46_p1, %s44_s19), 0  ;;  %p3503_p8 = scmp.eq.s32.totalorder %s2971_s11, 1 }
  0x3a   : > { %3502 = sst [smem:[#allocation23_spill]] %s3536_s19  ;;  %p62_p6 = por %p61_p4, %p60_p2 }
  0x3b   : > { %p3037_p10 = por %p3503_p8, %p60_p2  ;;  %s48_s25 = ssub.s32 %s2867_s9, %s3536_s19 }
  0x3c   : > { %p2498_p12 = scmp.lt.s32.totalorder %s2871_s10, 2  ;;  %p51_p0 = scmp.eq.s32.totalorder %s48_s25, 0 }
  0x3d   : > { %s3504_s24 = scalar_select %p3037_p10, 1, 0 }
  0x3e   : > { %s3475_s26 = sand.u32 1, %s2859_s29   ;;  %s3050_s12 = sshll.u32 %s2867_s9, 7 }
  0x3f   : > { %s3047_s17 = sshll.u32 %s3475_s26, 3  ;;  %p3055_p3 = pnand %p2498_p12, %p62_p6 }
  0x40   : > { %s3053_s21 = scalar_select %p51_p0, %s2859_s29, %s53_s23  }
  0x41   : > { %s3506_s22 = scalar_select %p3055_p3, 1, 0 }
  0x42   : > { %3505 = sst [smem:[#allocation24_spill]] %s3053_s21  ;;  %s333_s16 = sand.u32 1, %s2871_s10  }
  0x43   : > { %s3507_s1 = sld [smem:[#allocation25_spill]]  ;;  %s337_s26 = scalar_lea.vmem [#allocation5], %s3047_s17 }
  0x44   : > { %s344_s19 = sshll.u32 %s337_s26, 4  ;;  %s2876_s23 = smov [#allocation10]   ;;  %s3067_s19 = int_to_ptr.vmem [resolvable:$true] %s344_s19 }
  0x45   : > { %s3069_s9 = sshll.u32 %s2876_s23, 4  ;;  %s3071_s21 = scalar_lea.sflag [#allocation6], %s333_s16  ;;  %s298_s9 = int_to_ptr.vmem [resolvable:$true] %s3069_s9 }
  0x46   : > { %p3077_p7 = pneg %p3055_p3 }
  0x48   : > { %s3508_s3 = scalar_select %p3077_p7, 1, 0 }
  0x49   : > { %s3064_s25 = scalar_lea.hbm %s3507_s1, %s3050_s12  ;;  %s2636_s10 = scalar_lea.hbm %s3507_s1, 256 }
  0x4a   : > { %s2631_s14 = scalar_lea.hbm %s3064_s25, 128  ;;  %p2637_p2 = scmp.lt.u32.totalorder %s3064_s25, %s3507_s1 }
  0x4b   : > { %p2632_p5 = scmp.ne.s32.totalorder %s3064_s25, %s2631_s14  ;;  %p2638_p4 = scmp.lt.u32.totalorder %s2636_s10, %s2631_s14 }
  0x4c   : > { %p2640_p8 = scmp.lt.u32.totalorder %s2631_s14, %s3064_s25 }
  0x4d   : > { %p2634_p9 = pnand %p3077_p7, %p2632_p5  ;;  %p2639_p6 = por %p2638_p4, %p2637_p2 }
  0x4f   : > { %p2635_p1 = pneg %p2634_p9  ;;  %p2641_p12 = por %p2640_p8, %p2639_p6 }
  0x51   : > { %p2642_p0 = pnand %p2641_p12, %p2635_p1 }
  0x53   : > { %2645 = shalt.err (!%p2642_p0)
}
  0x54   : > { %s2646_s16 = scalar_lea.vmem %s3067_s19, 128  ;;  %s2877_s20 = smov [#allocation5]  }
  0x55   : > { %p2647_p5 = scmp.ne.s32.totalorder %s3067_s19, %s2646_s16  ;;  %s2651_s26 = sshll.u32 %s2877_s20, 4  ;;  %s2652_s26 = int_to_ptr.vmem [resolvable:$false] %s2651_s26 }
  0x56   : > { %s2653_s27 = scalar_lea.vmem %s2652_s26, 256  ;;  %p2654_p10 = scmp.lt.s32.totalorder %s3067_s19, %s2652_s26 }
  0x57   : > { %p2649_p9 = pnand %p2647_p5, %p3077_p7  ;;  %p2655_p11 = scmp.lt.s32.totalorder %s2653_s27, %s2646_s16 }
  0x59   : > { %p2650_p13 = pneg %p2649_p9  ;;  %p2656_p2 = por %p2655_p11, %p2654_p10 }
  0x5b   : > { %p2657_p4 = pnand %p2656_p2, %p2650_p13 }
  0x5d   : > { %2660 = shalt.err (!%p2657_p4)
}
  0x5e   : > { %2485 = dma.hbm_to_vmem [thread:$0]  (!%p3055_p3), %s3064_s25, 128, %s3067_s19, %s3071_s21  }
  0x5f   : > { %s3509_s5 = sld [smem:[#allocation27_spill]]  ;;  %p3510_p11 = scmp.ne.s32.totalorder %s3500_s18, 0 }
  0x61   : > { %p3511_p13 = pneg %p3510_p11 }
  0x65   : > { %s2661_s23 = scalar_lea.hbm %s3509_s5, 512 }
  0x66   : > { %p2662_p1 = scmp.ne.s32.totalorder %s3509_s5, %s2661_s23  ;;  %p2668_p8 = scmp.lt.u32.totalorder %s2661_s23, %s3509_s5 }
  0x68   : > { %p2664_p10 = pnand %p2662_p1, %p3511_p13 }
  0x6a   : > { %p2665_p6 = pneg %p2664_p10 }
  0x6c   : > { %p2670_p12 = pnand %p2668_p8, %p2665_p6 }
  0x6e   : > { %2673 = shalt.err (!%p2670_p12)
}
  0x6f   : > { %s2674_s19 = scalar_lea.vmem %s298_s9, 512  ;;  %p3512_p5 = pmov %p3511_p13 }
  0x70   : > { %p2675_p0 = scmp.ne.s32.totalorder %s298_s9, %s2674_s19  ;;  %p2682_p4 = scmp.lt.s32.totalorder %s298_s9, %s298_s9 }
  0x71   : > { %p2683_p3 = scmp.lt.s32.totalorder %s2674_s19, %s2674_s19 }
  0x72   : > { %p2677_p9 = pnand %p2675_p0, %p3512_p5 }
  0x73   : > { %p2684_p7 = por %p2683_p3, %p2682_p4 }
  0x74   : > { %p2678_p2 = pneg %p2677_p9 }
  0x76   : > { %p2685_p1 = pnand %p2684_p7, %p2678_p2 }
  0x78   : > { %2688 = shalt.err (!%p2685_p1)
}
  0x79   : > { %s3513_s1 = smov 8   ;;  %s3514_s25 = smov 128  }
  0x7a   : > { %2478 = dma.hbm_to_vmem [thread:$0]  (!%p3510_p11), %s3509_s5, 512, %s298_s9, [#allocation9], %s3514_s25, %s3514_s25, %s3513_s1  }
  0x7b   : > { %s3129_s20 = scalar_lea.hbm %s3461_s0, %s3050_s12  ;;  %s318_s18 = scalar_lea.vmem [#allocation2], %s3047_s17 }
  0x7c   : > { %s326_s16 = sshll.u32 %s318_s18, 4  ;;  %s3138_s27 = scalar_lea.hbm %s3463_s2, %s3050_s12  ;;  %s3132_s16 = int_to_ptr.vmem [resolvable:$true] %s326_s16 }
  0x7d   : > { %s3515_s10 = sand.u32 1, %s2859_s29   ;;  %s2689_s1 = scalar_lea.hbm %s3129_s20, 128 }
  0x7e   : > { %s315_s9 = scalar_lea.sflag [#allocation3], %s3515_s10  ;;  %p2690_p3 = scmp.ne.s32.totalorder %s3129_s20, %s2689_s1 }
  0x7f   : > { %p3516_p7 = scmp.ne.s32.totalorder %s3508_s3, 0  ;;  %s2694_s23 = scalar_lea.hbm %s3461_s0, 256 }
  0x80   : > { %p2695_p10 = scmp.lt.u32.totalorder %s3129_s20, %s3461_s0  ;;  %p2696_p6 = scmp.lt.u32.totalorder %s2694_s23, %s2689_s1 }
  0x81   : > { %p2692_p11 = pnand %p2690_p3, %p3516_p7  ;;  %p2698_p12 = scmp.lt.u32.totalorder %s2689_s1, %s3129_s20 }
  0x82   : > { %p2697_p8 = por %p2696_p6, %p2695_p10 }
  0x83   : > { %p2693_p13 = pneg %p2692_p11 }
  0x84   : > { %p2699_p0 = por %p2698_p12, %p2697_p8 }
  0x86   : > { %p2700_p5 = pnand %p2699_p0, %p2693_p13 }
  0x88   : > { %2703 = shalt.err (!%p2700_p5)
}
  0x89   : > { %s2704_s12 = scalar_lea.vmem %s3132_s16, 128  ;;  %s2878_s26 = smov [#allocation2]  }
  0x8a   : > { %p2705_p9 = scmp.ne.s32.totalorder %s3132_s16, %s2704_s12  ;;  %s2709_s19 = sshll.u32 %s2878_s26, 4  ;;  %s2710_s19 = int_to_ptr.vmem [resolvable:$false] %s2709_s19 }
  0x8b   : > { %s2711_s5 = scalar_lea.vmem %s2710_s19, 256  ;;  %p2712_p1 = scmp.lt.s32.totalorder %s3132_s16, %s2710_s19 }
  0x8c   : > { %p2707_p2 = pnand %p2705_p9, %p3516_p7  ;;  %p2713_p3 = scmp.lt.s32.totalorder %s2711_s5, %s2704_s12 }
  0x8e   : > { %p2708_p4 = pneg %p2707_p2  ;;  %p2714_p11 = por %p2713_p3, %p2712_p1 }
  0x90   : > { %p2715_p10 = pnand %p2714_p11, %p2708_p4 }
  0x92   : > { %2718 = shalt.err (!%p2715_p10)
}
  0x93   : > { %p3517_p13 = scmp.ne.s32.totalorder %s3506_s22, 0  ;;  %s355_s10 = scalar_lea.vmem [#allocation7], %s3047_s17 }
  0x94   : > { %s362_s1 = sshll.u32 %s355_s10, 4  ;;  %s2719_s25 = scalar_lea.hbm %s3138_s27, 128  ;;  %s363_s1 = int_to_ptr.vmem [resolvable:$true] %s362_s1 }
  0x95   : > { %2482 = dma.hbm_to_vmem [thread:$0]  (!%p3517_p13), %s3129_s20, 128, %s3132_s16, %s315_s9  }
  0x96   : > { %p2720_p6 = scmp.ne.s32.totalorder %s3138_s27, %s2719_s25  ;;  %s2724_s18 = scalar_lea.hbm %s3463_s2, 256 }
  0x97   : > { %p2725_p0 = scmp.lt.u32.totalorder %s3138_s27, %s3463_s2  ;;  %p2726_p5 = scmp.lt.u32.totalorder %s2724_s18, %s2719_s25 }
  0x98   : > { %p2722_p8 = pnand %p2720_p6, %p3516_p7  ;;  %p2728_p2 = scmp.lt.u32.totalorder %s2719_s25, %s3138_s27 }
  0x99   : > { %p2727_p9 = por %p2726_p5, %p2725_p0 }
  0x9a   : > { %p2723_p12 = pneg %p2722_p8 }
  0x9b   : > { %p2729_p4 = por %p2728_p2, %p2727_p9 }
  0x9d   : > { %p2730_p1 = pnand %p2729_p4, %p2723_p12 }
  0x9f   : > { %2733 = shalt.err (!%p2730_p1)
}
  0xa0   : > { %s2734_s17 = scalar_lea.vmem %s363_s1, 128  ;;  %s2879_s20 = smov [#allocation7]  }
  0xa1   : > { %p2735_p3 = scmp.ne.s32.totalorder %s363_s1, %s2734_s17  ;;  %s2739_s16 = sshll.u32 %s2879_s20, 4  ;;  %s2740_s16 = int_to_ptr.vmem [resolvable:$false] %s2739_s16 }
  0xa2   : > { %s2741_s9 = scalar_lea.vmem %s2740_s16, 256  ;;  %p2742_p6 = scmp.lt.s32.totalorder %s363_s1, %s2740_s16 }
  0xa3   : > { %p2737_p11 = pnand %p2735_p3, %p3516_p7  ;;  %p2743_p8 = scmp.lt.s32.totalorder %s2741_s9, %s2734_s17 }
  0xa5   : > { %p2738_p10 = pneg %p2737_p11  ;;  %p2744_p13 = por %p2743_p8, %p2742_p6 }
  0xa7   : > { %p2745_p0 = pnand %p2744_p13, %p2738_p10 }
  0xa9   : > { %2748 = shalt.err (!%p2745_p0)
}
  0xaa   : > { %p3518_p5 = scmp.ne.s32.totalorder %s3506_s22, 0  ;;  %p3519_p12 = scmp.ne.s32.totalorder %s3499_s15, 0 }
  0xab   : > { %s3185_s3 = sand.u32 (!%p3519_p12), 1, %s2855_s28   ;;  %p3520_p7 = scmp.ne.s32.totalorder (!%p3519_p12), %s3496_s13, 0 }
  0xac   : > { %2488 = dma.hbm_to_vmem [thread:$0]  (!%p3518_p5), %s3138_s27, 128, %s363_s1, %s3071_s21  }
  0xad   : > { %371 = sbr.rel (%p3519_p12) target bundleno = 1804 (0x70c), region = 48  ;;  %s3188_s19 = sshll.u32 (!%p3519_p12), %s3185_s3, 3 }
  0xae   : > { %s374_s5 = scalar_lea.sflag (!%p3519_p12), [#allocation3], %s3185_s3  ;;  %s377_s10 = scalar_lea.vmem (!%p3519_p12), [#allocation2], %s3188_s19 }
  0xb4   : > { %2830 = dma.done.wait (%p3520_p7), %s374_s5, 128  }
  0xb5   : > { %2832 = vsyncadd (%p3520_p7), %s374_s5, 4294967168  ;;  %s382_s15 = sand.u32 1, %s2971_s11   ;;  %s386_s22 = scalar_lea.vmem [#allocation5], %s3188_s19 }
  0xb6   : > { %s383_s21 = scalar_lea.sflag [#allocation6], %s382_s15 }
  0xb7   : > { %2834 = dma.done.wait (%p3520_p7), %s383_s21, 256  }
  0xb8   : > { %2836 = vsyncadd (%p3520_p7), %s383_s21, 4294967040  ;;  %s395_s27 = scalar_lea.vmem [#allocation7], %s3188_s19  ;;  %p3521_p13 = scmp.eq.s32.totalorder %s2971_s11, 0 }
  0xba   : > { %2838 = dma.done.wait (%p3521_p13), [#allocation9], 1024   ;;  %p3522_p9 = pmov %p3521_p13 }
  0xbb   : > { %v2880_v0 = vmov 0.0|0.0   ;;  %vm2881_vm0 = vmmov 0   ;;  %v2882_v1 = vmov 0.0   ;;  %v454_v2 = vld [vmem:[#allocation8] sm:$0xff]  ;;  %v455_v3 = vld [vmem:[#allocation8 + $0x8] sm:$0xff]  ;;  %v456_v4 = vld [vmem:[#allocation8 + $0x10] sm:$0xff]  ;;  %v734_v31 = vlaneseq }
  0xbc   : > { %2840 = vsyncadd (%p3522_p9), [#allocation9], 4294966272  ;;  %2430 = vmatprep.subr.bf16.mxu0 %v2880_v0  ;;  %2436 = vmatprep.subr.bf16.mxu1 %v2880_v0  ;;  %v2567_v5 = vpack.i.bf16 %v455_v3, %v454_v2  ;;  %v457_v6 = vld [vmem:[#allocation8 + $0x18] sm:$0xff]  ;;  %v2431_v7 = vpack.c.bf16 %v455_v3, %v454_v2  ;;  %v3216_v8 = vld [vmem:[%s3465_s4] ss:$0 sm:$0xff]  ;;  %s2883_s1 = smov 96  }
  0xbd   : > { %2354 = vmatprep.mubr.msk.f32.mxu0 %vm2881_vm0, %v2882_v1  ;;  %2365 = vmatprep.mubr.msk.f32.mxu1 %vm2881_vm0, %v2882_v1  ;;  %v2572_v9 = vpack.i.bf16 %v457_v6, %v456_v4  ;;  %v2434_v10 = vpack.c.bf16 %v457_v6, %v456_v4  ;;  %v451_v11 = vld [vmem:[%s377_s10] sm:$0xff]  ;;  %vm465_vm1 = vcmask 261120   ;;  %v452_v20 = vld [vmem:[%s386_s22] sm:$0xff]  ;;  %s2884_s25 = smov 120   ;;  %s2885_s14 = smov 112   ;;  %v735_v35 = vshrl.u32 %v734_v31, 7 }
  0xbe   : > { %2568 = vrot.lane.b32.xlu0 %v2567_v5, %s2883_s1  ;;  %2432 = vmatpush3.bf16.msra.mxu0 %v2431_v7  ;;  %s2886_s23 = smov 104   ;;  %s2887_s18 = smov 64   ;;  %v2888_v29 = vmov 1983009808   ;;  %v2889_v32 = vmov 1934713408  }
  0xbf   : > { %2433 = vmatprep.subr.bf16.mxu0 %v2880_v0  ;;  %555 = vrot.lane.b32.xlu1 %v3216_v8, %s2883_s1  ;;  %v732_v30 = vunpack.c.l.s4 %v2888_v29  ;;  %v764_v33 = vunpack.c.l.s4 %v2889_v32  ;;  %vm1157_vm2 = vcmask 64512   ;;  %s450_s12 = scalar_lea.vmem [#allocation12], %s3188_s19  ;;  %s2890_s26 = smov 24   ;;  %vm1951_vm3 = vcmask 130048  }
  0xc0   : > { %s2891_s17 = smov 8   ;;  %s2892_s20 = smov 16   ;;  %vm1953_vm4 = vcmask 195584  }
  0xc1   : > { %v733_v34 = vunpack.c.0.s8 %v732_v30  ;;  %v765_v38 = vunpack.c.0.s8 %v764_v33  ;;  %s2306_s16 = sshll.u32 %s2863_s30, 7  ;;  %s2083_s15 = sshll.u32 %s450_s12, 4  ;;  %s2084_s15 = int_to_ptr.vmem [resolvable:$true] %s2083_s15 }
  0xc2   : > { %2573 = vrot.lane.b32.xlu0 %v2572_v9, %s2883_s1  ;;  %2435 = vmatpush3.bf16.msra.mxu0 %v2434_v10  ;;  %s3380_s10 = scalar_lea.hbm %s3469_s8, %s2306_s16  ;;  %s2055_s21 = scalar_lea.sflag [#allocation13], %s3185_s3 }
  0xc3   : > { %2442 = vmatprep.subr.bf16.mxu0 %v2880_v0  ;;  %v3242_v39 = vsub.s32 %v733_v34, %v735_v35  ;;  %v3244_v46 = vsub.s32 %v765_v38, %v735_v35  ;;  %s2749_s22 = scalar_lea.vmem %s2084_s15, 128  ;;  %p3523_p4 = scmp.ne.s32.totalorder %s3504_s24, 0 }
  0xc4   : > { %p2750_p2 = scmp.ne.s32.totalorder %s2084_s15, %s2749_s22 }
  0xc5   : > { %2355 = vmatmul.mubr.msk.f32.vlgmr.msra.gmra.mrb[0].mxu0 %vm465_vm1, %v451_v11 }
  0xc6   : > { %2376 = vmatprep.mubr.msk.f32.mxu0 %vm2881_vm0, %v2882_v1  ;;  %p2751_p1 = pnand %p2750_p2, %p3523_p4 }
  0xc8   : > { %p2752_p3 = pneg %p2751_p1 }
 0x130   : > { %v2569_v12 = vpop.permute.xlu0 %2568 }
 0x131   : > { %v2571_v13 = vunpack.i.h.bf16 %v2569_v12  ;;  %v2570_v14 = vunpack.i.l.bf16 %v2569_v12  ;;  %v556_v24 = vpop.permute.xlu1 %555 }
 0x133   : > { %v2437_v15 = vpack.c.bf16 %v2571_v13, %v2570_v14 }
 0x134   : > { %v2574_v16 = vpop.permute.xlu0 %2573 }
 0x135   : > { %v2576_v17 = vunpack.i.h.bf16 %v2574_v16  ;;  %v2575_v18 = vunpack.i.l.bf16 %v2574_v16  ;;  %2438 = vmatpush3.bf16.msra.mxu1 %v2437_v15 }
 0x136   : > { %2439 = vmatprep.subr.bf16.mxu1 %v2880_v0 }
 0x137   : > { %v2440_v19 = vpack.c.bf16 %v2576_v17, %v2575_v18 }
 0x139   : > { %2441 = vmatpush3.bf16.msra.mxu1 %v2440_v19 }
 0x13a   : > { %2379 = vmatprep.subr.mxu1 %v2882_v1 }
 0x13c   : > { %2366 = vmatmul.mubr.msk.f32.vlgmr.msra.gmra.mrb[0].mxu1 %vm465_vm1, %v452_v20 }
 0x13d   : > { %2381 = vmatprep.mubr.msk.f32.mxu1 %vm2881_vm0, %v2882_v1 }
 0x198   : > { %v535_v21 = vpop.f32.mrb[0].mxu0 }
 0x199   : > { %v536_v22 = vadd.f32 %v3216_v8, %v535_v21  ;;  %v2356_v23 = vpop.f32.mrb[1].mxu0 }
 0x19b   : > { %720 = vrot.lane.b32.xlu0 %v536_v22, %s2884_s25 }
 0x20d   : > { %v721_v28 = vpop.permute.xlu0 %720 }
 0x20f   : > { %v627_v25 = vpop.f32.mrb[0].mxu1 }
 0x210   : > { %v628_v26 = vadd.f32 %v627_v25, %v556_v24  ;;  %v2367_v27 = vpop.f32.mrb[1].mxu1 }
 0x212   : > { %866 = vrot.lane.b32.xlu1 %v628_v26, %s2884_s25  ;;  %869 = vrot.lane.b32.xlu0 %v628_v26, %s2885_s14 }
 0x216   : > { %872 = vrot.lane.b32.xlu1 %v628_v26, %s2886_s23  ;;  %726 = vrot.lane.b32.xlu0 %v536_v22, %s2886_s23 }
 0x21a   : > { %723 = vrot.lane.b32.xlu1 %v536_v22, %s2885_s14  ;;  %2583 = vrot.lane.b32.xlu0 %v2572_v9, %s2887_s18 }
 0x21e   : > { %2578 = vrot.lane.b32.xlu1 %v2567_v5, %s2887_s18 }
 0x284   : > { %v867_v36 = vpop.permute.xlu1 %866  ;;  %v870_v37 = vpop.permute.xlu0 %869 }
 0x285   : > { %v875_v40 = vcombine.low %v628_v26, %v870_v37  ;;  %v876_v41 = vcombine.high %v628_v26, %v870_v37 }
 0x287   : > { %v883_v47 = vrot.slane %v875_v40, %v3242_v39  ;;  %v890_v48 = vrot.slane %v876_v41, %v3242_v39 }
 0x288   : > { %v873_v42 = vpop.permute.xlu1 %872  ;;  %v727_v45 = vpop.permute.xlu0 %726 }
 0x289   : > { %v891_v43 = vcombine.low %v867_v36, %v873_v42  ;;  %v892_v44 = vcombine.high %v867_v36, %v873_v42  ;;  %v745_v51 = vcombine.low %v721_v28, %v727_v45  ;;  %v746_v52 = vcombine.high %v721_v28, %v727_v45 }
 0x28b   : > { %v899_v49 = vrot.slane %v891_v43, %v3242_v39  ;;  %v906_v50 = vrot.slane %v892_v44, %v3242_v39  ;;  %v753_v2 = vrot.slane %v745_v51, %v3242_v39  ;;  %v760_v3 = vrot.slane %v746_v52, %v3242_v39 }
 0x28c   : > { %v724_v53 = vpop.permute.xlu1 %723  ;;  %v2584_v51 = vpop.permute.xlu0 %2583 }
 0x28d   : > { %v907_v54 = vcombine.low %v883_v47, %v899_v49  ;;  %v908_v55 = vcombine.high %v883_v47, %v899_v49  ;;  %v923_v56 = vcombine.low %v890_v48, %v906_v50  ;;  %v924_v57 = vcombine.high %v890_v48, %v906_v50 }
 0x28e   : > { %v729_v58 = vcombine.low %v536_v22, %v724_v53  ;;  %v730_v59 = vcombine.high %v536_v22, %v724_v53 }
 0x28f   : > { %v915_v60 = vrot.slane %v907_v54, %v3244_v46  ;;  %v922_v61 = vrot.slane %v908_v55, %v3244_v46  ;;  %v931_v62 = vrot.slane %v923_v56, %v3244_v46  ;;  %v938_v63 = vrot.slane %v924_v57, %v3244_v46 }
 0x290   : > { %v737_v4 = vrot.slane %v729_v58, %v3242_v39  ;;  %v744_v5 = vrot.slane %v730_v59, %v3242_v39  ;;  %v2579_v50 = vpop.permute.xlu1 %2578  ;;  %v2586_v57 = vunpack.i.h.bf16 %v2584_v51  ;;  %v2585_v58 = vunpack.i.l.bf16 %v2584_v51 }
 0x291   : > { %v943_v6 = vcombine.low %v915_v60, %v922_v61  ;;  %v2284_v7 = vcombine.high %v915_v60, %v922_v61  ;;  %v959_v9 = vcombine.low %v931_v62, %v938_v63  ;;  %v2285_v10 = vcombine.high %v931_v62, %v938_v63 }
 0x292   : > { %v761_v11 = vcombine.low %v737_v4, %v753_v2  ;;  %v762_v12 = vcombine.high %v737_v4, %v753_v2  ;;  %v777_v13 = vcombine.low %v744_v5, %v760_v3  ;;  %v778_v14 = vcombine.high %v744_v5, %v760_v3  ;;  %v453_v3 = vld [vmem:[%s395_s27] sm:$0xff]  ;;  %s2893_s27 = smov [#allocation12]  }
 0x293   : > { %v950_v15 = vrot.slane %v943_v6, %v3242_v39  ;;  %v958_v16 = vrot.slane %v2284_v7, %v3242_v39  ;;  %v966_v17 = vrot.slane %v959_v9, %v3242_v39  ;;  %v974_v18 = vrot.slane %v2285_v10, %v3242_v39  ;;  %s2753_s11 = sshll.u32 %s2893_s27, 4  ;;  %s2754_s11 = int_to_ptr.vmem [resolvable:$false] %s2753_s11 }
 0x294   : > { %v769_v19 = vrot.slane %v761_v11, %v3244_v46  ;;  %v776_v20 = vrot.slane %v762_v12, %v3244_v46  ;;  %v785_v21 = vrot.slane %v777_v13, %v3244_v46  ;;  %v792_v22 = vrot.slane %v778_v14, %v3244_v46  ;;  %s2755_s13 = scalar_lea.vmem %s2754_s11, 256  ;;  %p2756_p11 = scmp.lt.s32.totalorder %s2084_s15, %s2754_s11 }
 0x295   : > { %v975_v23 = vcombine.low %v950_v15, %v958_v16  ;;  %v991_v24 = vcombine.low %v966_v17, %v974_v18  ;;  %v976_v38 = vcombine.high %v950_v15, %v958_v16  ;;  %v992_v40 = vcombine.high %v966_v17, %v974_v18  ;;  %p2757_p10 = scmp.lt.s32.totalorder %s2755_s13, %s2749_s22 }
 0x296   : > { %v797_v25 = vcombine.low %v769_v19, %v776_v20  ;;  %v2282_v26 = vcombine.high %v769_v19, %v776_v20  ;;  %v813_v27 = vcombine.low %v785_v21, %v792_v22  ;;  %v2283_v28 = vcombine.high %v785_v21, %v792_v22 }
 0x297   : > { %v983_v29 = vrot.slane %v975_v23, %v3244_v46  ;;  %v999_v30 = vrot.slane %v991_v24, %v3244_v46  ;;  %v990_v48 = vrot.slane %v976_v38, %v3244_v46  ;;  %v1006_v49 = vrot.slane %v992_v40, %v3244_v46  ;;  %p2758_p6 = por %p2757_p10, %p2756_p11 }
 0x298   : > { %v804_v31 = vrot.slane %v797_v25, %v3242_v39  ;;  %v812_v32 = vrot.slane %v2282_v26, %v3242_v39  ;;  %v820_v33 = vrot.slane %v813_v27, %v3242_v39  ;;  %v828_v34 = vrot.slane %v2283_v28, %v3242_v39 }
 0x299   : > { %v1007_v35 = vcombine.low %v983_v29, %v999_v30  ;;  %v1008_v47 = vcombine.high %v983_v29, %v999_v30  ;;  %v2581_v53 = vunpack.i.h.bf16 %v2579_v50  ;;  %v2580_v54 = vunpack.i.l.bf16 %v2579_v50  ;;  %p2759_p8 = pnand %p2758_p6, %p2752_p3 }
 0x29a   : > { %v829_v36 = vcombine.low %v804_v31, %v812_v32  ;;  %v845_v37 = vcombine.low %v820_v33, %v828_v34  ;;  %v830_v43 = vcombine.high %v804_v31, %v812_v32  ;;  %v846_v44 = vcombine.high %v820_v33, %v828_v34 }
 0x29b   : > { %2380 = vmatpush3.xpose.msk.msra.mxu1 %vm1157_vm2, %v1007_v35  ;;  %v1009_v59 = vcombine.low %v990_v48, %v1006_v49  ;;  %v2443_v60 = vpack.c.bf16 %v2581_v53, %v2580_v54  ;;  %v2446_v62 = vpack.c.bf16 %v2586_v57, %v2585_v58  ;;  %v1010_v63 = vcombine.high %v990_v48, %v1006_v49 }
 0x29c   : > { %2384 = vmatprep.subr.mxu1 %v2882_v1  ;;  %v837_v41 = vrot.slane %v829_v36, %v3244_v46  ;;  %v853_v42 = vrot.slane %v845_v37, %v3244_v46  ;;  %v844_v52 = vrot.slane %v830_v43, %v3244_v46  ;;  %v860_v56 = vrot.slane %v846_v44, %v3244_v46 }
 0x29d   : > { %2444 = vmatpush3.bf16.msra.mxu0 %v2443_v60 }
 0x29e   : > { %v861_v45 = vcombine.low %v837_v41, %v853_v42  ;;  %v862_v55 = vcombine.high %v837_v41, %v853_v42  ;;  %v863_v61 = vcombine.low %v844_v52, %v860_v56  ;;  %2445 = vmatprep.subr.bf16.mxu0 %v2880_v0  ;;  %v864_v2 = vcombine.high %v844_v52, %v860_v56 }
 0x2a0   : > { %2382 = vmatmul.mubr.msk.f32.vlgmr.msra.gmra.mrb[2].mxu1 %vm1157_vm2, %v861_v45 }
 0x2a1   : > { %2385 = vmatpush3.xpose.msk.msra.mxu1 %vm1157_vm2, %v1008_v47  ;;  %2386 = vmatprep.mubr.msk.f32.mxu1 %vm2881_vm0, %v2882_v1 }
 0x2a2   : > { %2389 = vmatprep.subr.mxu1 %v2882_v1  ;;  %2447 = vmatpush3.bf16.msra.mxu0 %v2446_v62 }
 0x2a3   : > { %2399 = vmatprep.subr.mxu0 %v2882_v1 }
 0x2a4   : > { %2387 = vmatmul.mubr.msk.f32.vlgmr.msra.gmra.mrb[4].mxu1 %vm1157_vm2, %v862_v55 }
 0x2a5   : > { %2390 = vmatpush3.xpose.msk.msra.mxu1 %vm1157_vm2, %v1009_v59  ;;  %2391 = vmatprep.mubr.msk.f32.mxu1 %vm2881_vm0, %v2882_v1 }
 0x2a6   : > { %2394 = vmatprep.subr.mxu1 %v2882_v1  ;;  %2377 = vmatmul.mubr.msk.f32.vlgmr.msra.gmra.mrb[2].mxu0 %vm465_vm1, %v453_v3 }
 0x2a7   : > { %2401 = vmatprep.mubr.msk.f32.mxu0 %vm2881_vm0, %v2882_v1 }
 0x2a8   : > { %2392 = vmatmul.mubr.msk.f32.vlgmr.msra.gmra.mrb[6].mxu1 %vm1157_vm2, %v863_v61 }
 0x2a9   : > { %2395 = vmatpush3.xpose.msk.msra.mxu1 %vm1157_vm2, %v1010_v63  ;;  %2396 = vmatprep.mubr.msk.f32.mxu1 %vm2881_vm0, %v2882_v1 }
 0x2aa   : > { %2404 = vmatprep.subr.mxu1 %v2882_v1 }
 0x2ac   : > { %2397 = vmatmul.mubr.msk.f32.vlgmr.msra.gmra.mrb[8].mxu1 %vm1157_vm2, %v864_v2 }
 0x2ad   : > { %2406 = vmatprep.mubr.msk.f32.mxu1 %vm2881_vm0, %v2882_v1 }
 0x373   : > { %v1230_v4 = vpop.f32.mrb[2].mxu1 }
 0x374   : > { %v2383_v5 = vpop.f32.mrb[3].mxu1  ;;  %v1462_v6 = vsel %vm1157_vm2, %v1230_v4, -inf }
 0x375   : > { %1463 = vmax.xlane.f32.xlu1 %v1462_v6 }
 0x377   : > { %v1306_v7 = vpop.f32.mrb[4].mxu1 }
 0x378   : > { %v2388_v9 = vpop.f32.mrb[5].mxu1  ;;  %v1465_v10 = vsel %vm1157_vm2, %v1306_v7, -inf }
 0x379   : > { %1466 = vmax.xlane.f32.xlu0 %v1465_v10  ;;  %v715_v17 = vpop.f32.mrb[2].mxu0 }
 0x37a   : > { %v2378_v18 = vpop.f32.mrb[3].mxu0 }
 0x37b   : > { %v1382_v11 = vpop.f32.mrb[6].mxu1 }
 0x37c   : > { %v2393_v12 = vpop.f32.mrb[7].mxu1  ;;  %v1468_v13 = vsel %vm1157_vm2, %v1382_v11, -inf }
 0x37d   : > { %1469 = vmax.xlane.f32.xlu0 %v1468_v13 }
 0x37f   : > { %v1458_v14 = vpop.f32.mrb[8].mxu1 }
 0x380   : > { %v2398_v15 = vpop.f32.mrb[9].mxu1  ;;  %v1471_v16 = vsel %vm1157_vm2, %v1458_v14, -inf }
 0x381   : > { %1472 = vmax.xlane.f32.xlu1 %v1471_v16 }
 0x393   : > { %643 = vrot.lane.b32.xlu0 %v3216_v8, %s2887_s18 }
 0x402   : > { %v1464_v19 = vpop.xlane.xlu1 %1463 }
 0x403   : > { %v1474_v20 = vsub.f32 %v1230_v4, %v1464_v19 }
 0x405   : > { %v1478_v21 = vmul.f32 1.442695, %v1474_v20 }
 0x406   : > { %v1467_v22 = vpop.xlane.xlu0 %1466 }
 0x407   : > { %2587 = vpow2.f32 %v1478_v21  ;;  %v1475_v23 = vsub.f32 %v1306_v7, %v1467_v22 }
 0x409   : > { %v1480_v24 = vmul.f32 1.442695, %v1475_v23 }
 0x40a   : > { %v1470_v25 = vpop.xlane.xlu0 %1469 }
 0x40b   : > { %2589 = vpow2.f32 %v1480_v24  ;;  %v1476_v26 = vsub.f32 %v1382_v11, %v1470_v25 }
 0x40d   : > { %v1482_v27 = vmul.f32 1.442695, %v1476_v26 }
 0x40e   : > { %v1473_v28 = vpop.xlane.xlu1 %1472  ;;  %v644_v29 = vpop.permute.xlu0 %643 }
 0x40f   : > { %2591 = vpow2.f32 %v1482_v27  ;;  %v1477_v30 = vsub.f32 %v1458_v14, %v1473_v28  ;;  %v716_v31 = vadd.f32 %v715_v17, %v644_v29 }
 0x411   : > { %v2588_v32 = vpop.eup %2587  ;;  %v1484_v33 = vmul.f32 1.442695, %v1477_v30  ;;  %1015 = vrot.lane.b32.xlu0 %v716_v31, %s2885_s14 }
 0x412   : > { %v1486_v8 = vsel %vm1157_vm2, %v2588_v32, 0.0 }
 0x413   : > { %2593 = vpow2.f32 %v1484_v33  ;;  %1487 = vadd.xlane.f32.xlu1 %v1486_v8 }
 0x415   : > { %v2590_v34 = vpop.eup %2589  ;;  %1018 = vrot.lane.b32.xlu0 %v716_v31, %s2886_s23 }
 0x416   : > { %v1489_v35 = vsel %vm1157_vm2, %v2590_v34, 0.0 }
 0x417   : > { %1490 = vadd.xlane.f32.xlu1 %v1489_v35 }
 0x419   : > { %v2592_v36 = vpop.eup %2591 }
 0x41a   : > { %v1492_v37 = vsel %vm1157_vm2, %v2592_v36, 0.0 }
 0x41b   : > { %1493 = vadd.xlane.f32.xlu1 %v1492_v37 }
 0x41d   : > { %v2594_v38 = vpop.eup %2593 }
 0x41e   : > { %v1495_v40 = vsel %vm1157_vm2, %v2594_v38, 0.0 }
 0x41f   : > { %1496 = vadd.xlane.f32.xlu1 %v1495_v40  ;;  %v1955_v40 = vld [vmem:[#allocation10] sm:$0xff] }
 0x430   : > { %1012 = vrot.lane.b32.xlu1 %v716_v31, %s2884_s25 }
 0x483   : > { %v1016_v44 = vpop.permute.xlu0 %1015 }
 0x484   : > { %v1021_v49 = vcombine.low %v716_v31, %v1016_v44  ;;  %v1022_v50 = vcombine.high %v716_v31, %v1016_v44 }
 0x486   : > { %v1029_v58 = vrot.slane %v1021_v49, %v3242_v39  ;;  %v1036_v59 = vrot.slane %v1022_v50, %v3242_v39 }
 0x487   : > { %v1019_v52 = vpop.permute.xlu0 %1018 }
 0x4a0   : > { %v1488_v41 = vpop.xlane.xlu1 %1487 }
 0x4a1   : > { %2595 = vrcp.f32 %v1488_v41  ;;  %v1956_v41 = vld [vmem:[#allocation10 + $0x8] sm:$0xff] }
 0x4a4   : > { %v1491_v42 = vpop.xlane.xlu1 %1490 }
 0x4a5   : > { %2597 = vrcp.f32 %v1491_v42  ;;  %v2449_v42 = vpack.c.bf16 %v1956_v41, %v1955_v40 }
 0x4a8   : > { %v1494_v43 = vpop.xlane.xlu1 %1493 }
 0x4a9   : > { %2599 = vrcp.f32 %v1494_v43 }
 0x4ab   : > { %v2596_v47 = vpop.eup %2595 }
 0x4ac   : > { %v1497_v45 = vpop.xlane.xlu1 %1496  ;;  %v1506_v56 = vmul.f32 %v2596_v47, %v2588_v32 }
 0x4ad   : > { %2601 = vrcp.f32 %v1497_v45 }
 0x4ae   : > { %v2040_v6 = vsel %vm1157_vm2, %v1506_v56, 0.0 }
 0x4af   : > { %v2598_v48 = vpop.eup %2597 }
 0x4b0   : > { %v1507_v51 = vmul.f32 %v2598_v48, %v2590_v34  ;;  %v1013_v53 = vpop.permute.xlu1 %1012 }
 0x4b1   : > { %v1037_v54 = vcombine.low %v1013_v53, %v1019_v52  ;;  %v1038_v55 = vcombine.high %v1013_v53, %v1019_v52 }
 0x4b2   : > { %v2041_v62 = vsel %vm1157_vm2, %v1507_v51, 0.0 }
 0x4b3   : > { %v2600_v57 = vpop.eup %2599  ;;  %v1045_v60 = vrot.slane %v1037_v54, %v3242_v39  ;;  %v1052_v61 = vrot.slane %v1038_v55, %v3242_v39  ;;  %v2042_v10 = vadd.f32 %v2041_v62, %v2040_v6  ;;  %v1957_v62 = vld [vmem:[#allocation10 + $0x10] sm:$0xff] }
 0x4b4   : > { %v1508_v63 = vmul.f32 %v2600_v57, %v2592_v36 }
 0x4b5   : > { %v1053_v2 = vcombine.low %v1029_v58, %v1045_v60  ;;  %v1054_v3 = vcombine.high %v1029_v58, %v1045_v60  ;;  %v1069_v4 = vcombine.low %v1036_v59, %v1052_v61  ;;  %v1070_v5 = vcombine.high %v1036_v59, %v1052_v61 }
 0x4b6   : > { %v2043_v7 = vsel %vm1157_vm2, %v1508_v63, 0.0 }
 0x4b7   : > { %v2602_v9 = vpop.eup %2601  ;;  %v1061_v11 = vrot.slane %v1053_v2, %v3244_v46  ;;  %v1068_v12 = vrot.slane %v1054_v3, %v3244_v46  ;;  %v1077_v13 = vrot.slane %v1069_v4, %v3244_v46  ;;  %v1084_v15 = vrot.slane %v1070_v5, %v3244_v46 }
 0x4b8   : > { %v1509_v14 = vmul.f32 %v2602_v9, %v2594_v38  ;;  %v2044_v16 = vadd.f32 %v2043_v7, %v2042_v10 }
 0x4b9   : > { %v1089_v17 = vcombine.low %v1061_v11, %v1068_v12  ;;  %v2286_v18 = vcombine.high %v1061_v11, %v1068_v12  ;;  %v1105_v20 = vcombine.low %v1077_v13, %v1084_v15  ;;  %v2287_v21 = vcombine.high %v1077_v13, %v1084_v15 }
 0x4ba   : > { %v2045_v19 = vsel %vm1157_vm2, %v1509_v14, 0.0 }
 0x4bb   : > { %v1096_v22 = vrot.slane %v1089_v17, %v3242_v39  ;;  %v1104_v23 = vrot.slane %v2286_v18, %v3242_v39  ;;  %v2046_v24 = vadd.f32 %v2045_v19, %v2044_v16  ;;  %v1112_v25 = vrot.slane %v1105_v20, %v3242_v39 }
 0x4bc   : > { %v1120_v26 = vrot.slane %v2287_v21, %v3242_v39 }
 0x4bd   : > { %v1121_v27 = vcombine.low %v1096_v22, %v1104_v23  ;;  %v1122_v28 = vcombine.high %v1096_v22, %v1104_v23  ;;  %v2047_v29 = vmul.f32 0.25, %v2046_v24 }
 0x4be   : > { %v1137_v30 = vcombine.low %v1112_v25, %v1120_v26  ;;  %v1138_v31 = vcombine.high %v1112_v25, %v1120_v26 }
 0x4bf   : > { %v1129_v32 = vrot.slane %v1121_v27, %v3244_v46  ;;  %2048 = vst.msk [vmem:[%s450_s12] sm:$0xff] %vm1157_vm2, %v2047_v29  ;;  %v1136_v8 = vrot.slane %v1122_v28, %v3244_v46 }
 0x4c0   : > { %v1145_v33 = vrot.slane %v1137_v30, %v3244_v46  ;;  %v1152_v34 = vrot.slane %v1138_v31, %v3244_v46 }
 0x4c2   : > { %v1153_v35 = vcombine.low %v1129_v32, %v1145_v33  ;;  %v1154_v36 = vcombine.high %v1129_v32, %v1145_v33  ;;  %v1155_v37 = vcombine.low %v1136_v8, %v1152_v34  ;;  %v1156_v38 = vcombine.high %v1136_v8, %v1152_v34 }
 0x4c4   : > { %2400 = vmatpush3.msra.mxu0 %v1153_v35  ;;  %2405 = vmatpush3.msra.mxu1 %v1154_v36 }
 0x4c5   : > { %2402 = vmatmul.mubr.msk.f32.vlgmr.msra.gmra.mrb[4].mxu0 %vm1157_vm2, %v1506_v56  ;;  %2407 = vmatmul.mubr.msk.f32.vlgmr.msra.gmra.mrb[10].mxu1 %vm1157_vm2, %v1507_v51 }
 0x4c6   : > { %2409 = vmatprep.subr.mxu0 %v2882_v1  ;;  %2414 = vmatprep.subr.mxu1 %v2882_v1 }
 0x4c7   : > { %2410 = vmatpush3.msra.mxu0 %v1155_v37  ;;  %2415 = vmatpush3.msra.mxu1 %v1156_v38 }
 0x4c8   : > { %2411 = vmatprep.mubr.msk.f32.mxu0 %vm2881_vm0, %v2882_v1  ;;  %2416 = vmatprep.mubr.msk.f32.mxu1 %vm2881_vm0, %v2882_v1 }
 0x4c9   : > { %2412 = vmatmul.mubr.msk.f32.vlgmr.msra.gmra.mrb[6].mxu0 %vm1157_vm2, %v1508_v63  ;;  %2417 = vmatmul.mubr.msk.f32.vlgmr.msra.gmra.mrb[12].mxu1 %vm1157_vm2, %v1509_v14  ;;  %v1958_v63 = vld [vmem:[#allocation10 + $0x18] sm:$0xff] }
 0x4ca   : > { %2448 = vmatprep.subr.bf16.mxu0 %v2880_v0  ;;  %2427 = vmatprep.mubr.msk.f32.mxu0 %vm2881_vm0, %v2882_v1  ;;  %v2452_v6 = vpack.c.bf16 %v1958_v63, %v1957_v62 }
 0x4cb   : > { %2450 = vmatpush3.bf16.msra.mxu0 %v2449_v42 }
 0x4cc   : > { %2451 = vmatprep.subr.bf16.mxu0 %v2880_v0 }
 0x4cf   : > { %2453 = vmatpush3.bf16.msra.mxu0 %v2452_v6 }
 0x598   : > { %v1579_v43 = vpop.f32.mrb[4].mxu0  ;;  %v1652_v44 = vpop.f32.mrb[10].mxu1 }
 0x599   : > { %v2403_v45 = vpop.f32.mrb[5].mxu0  ;;  %v2408_v47 = vpop.f32.mrb[11].mxu1 }
 0x59c   : > { %v1725_v48 = vpop.f32.mrb[6].mxu0  ;;  %v1798_v49 = vpop.f32.mrb[12].mxu1 }
 0x59d   : > { %v1802_v50 = vcombine.low %v1579_v43, %v1725_v48  ;;  %v1803_v51 = vcombine.high %v1579_v43, %v1725_v48  ;;  %v1818_v52 = vcombine.low %v1652_v44, %v1798_v49  ;;  %v1819_v53 = vcombine.high %v1652_v44, %v1798_v49  ;;  %v2413_v54 = vpop.f32.mrb[7].mxu0  ;;  %v2418_v55 = vpop.f32.mrb[13].mxu1 }
 0x59f   : > { %v1810_v1 = vrot.slane %v1802_v50, %v3242_v39  ;;  %v1817_v56 = vrot.slane %v1803_v51, %v3242_v39  ;;  %v1826_v57 = vrot.slane %v1818_v52, %v3242_v39  ;;  %v1833_v0 = vrot.slane %v1819_v53, %v3242_v39 }
 0x5a1   : > { %v1834_v58 = vcombine.low %v1810_v1, %v1826_v57  ;;  %v1835_v59 = vcombine.high %v1810_v1, %v1826_v57  ;;  %v1850_v60 = vcombine.low %v1817_v56, %v1833_v0  ;;  %v1851_v61 = vcombine.high %v1817_v56, %v1833_v0 }
 0x5a3   : > { %v1842_v2 = vrot.slane %v1834_v58, %v3244_v46  ;;  %v1849_v3 = vrot.slane %v1835_v59, %v3244_v46  ;;  %v1858_v4 = vrot.slane %v1850_v60, %v3244_v46  ;;  %v1865_v5 = vrot.slane %v1851_v61, %v3244_v46 }
 0x5a5   : > { %v1870_v7 = vcombine.low %v1842_v2, %v1849_v3  ;;  %v2300_v9 = vcombine.high %v1842_v2, %v1849_v3  ;;  %v1886_v10 = vcombine.low %v1858_v4, %v1865_v5  ;;  %v2301_v11 = vcombine.high %v1858_v4, %v1865_v5 }
 0x5a7   : > { %v1877_v12 = vrot.slane %v1870_v7, %v3242_v39  ;;  %v1885_v13 = vrot.slane %v2300_v9, %v3242_v39  ;;  %v1893_v14 = vrot.slane %v1886_v10, %v3242_v39  ;;  %v1901_v15 = vrot.slane %v2301_v11, %v3242_v39 }
 0x5a9   : > { %v1903_v16 = vcombine.high %v1877_v12, %v1885_v13  ;;  %v1919_v17 = vcombine.high %v1893_v14, %v1901_v15  ;;  %v1902_v18 = vcombine.low %v1877_v12, %v1885_v13  ;;  %v1918_v19 = vcombine.low %v1893_v14, %v1901_v15 }
 0x5ab   : > { %v1917_v20 = vrot.slane %v1903_v16, %v3244_v46  ;;  %v1933_v21 = vrot.slane %v1919_v17, %v3244_v46  ;;  %v1910_v22 = vrot.slane %v1902_v18, %v3244_v46  ;;  %v1926_v23 = vrot.slane %v1918_v19, %v3244_v46 }
 0x5ad   : > { %v1937_v24 = vcombine.high %v1917_v20, %v1933_v21  ;;  %v1935_v25 = vcombine.high %v1910_v22, %v1926_v23  ;;  %v1936_v26 = vcombine.low %v1917_v20, %v1933_v21  ;;  %v1934_v27 = vcombine.low %v1910_v22, %v1926_v23 }
 0x5af   : > { %1947 = vrot.lane.b32.xlu1 %v1937_v24, %s2890_s26  ;;  %1939 = vrot.lane.b32.xlu0 %v1935_v25, %s2891_s17 }
 0x5b3   : > { %1943 = vrot.lane.b32.xlu0 %v1936_v26, %s2892_s20 }
 0x621   : > { %v1940_v39 = vpop.permute.xlu0 %1939  ;;  %v1948_v29 = vpop.permute.xlu1 %1947 }
 0x622   : > { %v1950_v46 = vsel %vm1157_vm2, %v1934_v27, %v1940_v39 }
 0x625   : > { %v1944_v28 = vpop.permute.xlu0 %1943 }
 0x626   : > { %v1952_v30 = vsel %vm1951_vm3, %v1950_v46, %v1944_v28 }
 0x627   : > { %v1954_v31 = vsel %vm1953_vm4, %v1952_v30, %v1948_v29 }
 0x628   : > { %2428 = vmatmul.mubr.msk.f32.vlgmr.msra.gmra.mrb[8].mxu0 %vm465_vm1, %v1954_v31 }
 0x629   : > { %2762 = shalt.err (!%p2759_p8)
}
 0x62a   : > { %s2763_s1 = scalar_lea.hbm %s3380_s10, 128  ;;  %s2767_s23 = scalar_lea.hbm %s3469_s8, 256 }
 0x62b   : > { %p2764_p0 = scmp.ne.s32.totalorder %s3380_s10, %s2763_s1  ;;  %p2768_p7 = scmp.lt.u32.totalorder %s3380_s10, %s3469_s8 }
 0x62c   : > { %p2769_p13 = scmp.lt.u32.totalorder %s2767_s23, %s2763_s1  ;;  %p2771_p2 = scmp.lt.u32.totalorder %s2763_s1, %s3380_s10 }
 0x62d   : > { %p2765_p5 = pnand %p2764_p0, %p3523_p4 }
 0x62e   : > { %p2770_p9 = por %p2769_p13, %p2768_p7 }
 0x62f   : > { %p2766_p12 = pneg %p2765_p5 }
 0x630   : > { %p2772_p1 = por %p2771_p2, %p2770_p9 }
 0x632   : > { %p2773_p3 = pnand %p2772_p1, %p2766_p12 }
 0x634   : > { %2776 = shalt.err (!%p2773_p3)
}
 0x635   : > { %2469 = dma.vmem_to_hbm [thread:$0]  (%p3523_p4), %s2084_s15, 128, %s3380_s10, %s2055_s21   ;;  %v2302_v32 = vld [vmem:[%s3467_s6] ss:$0 sm:$0xff] }
 0x636   : > { %s443_s20 = scalar_lea.vmem [#allocation11], %s3188_s19  ;;  %s3411_s27 = scalar_lea.hbm %s3468_s7, %s2306_s16 }
 0x637   : > { %s2069_s9 = sshll.u32 %s443_s20, 4  ;;  %s2050_s10 = scalar_lea.sflag [#allocation4], %s3185_s3  ;;  %s3413_s9 = int_to_ptr.vmem [resolvable:$true] %s2069_s9 }
 0x638   : > { %s2777_s15 = scalar_lea.vmem %s3413_s9, 128  ;;  %s2894_s19 = smov [#allocation11]  }
 0x639   : > { %p2778_p11 = scmp.ne.s32.totalorder %s3413_s9, %s2777_s15  ;;  %s2781_s30 = sshll.u32 %s2894_s19, 4  ;;  %s2782_s30 = int_to_ptr.vmem [resolvable:$false] %s2781_s30 }
 0x63a   : > { %s2783_s21 = scalar_lea.vmem %s2782_s30, 256  ;;  %p2784_p8 = scmp.lt.s32.totalorder %s3413_s9, %s2782_s30 }
 0x63b   : > { %p2779_p10 = pnand %p2778_p11, %p3523_p4  ;;  %p2785_p0 = scmp.lt.s32.totalorder %s2783_s21, %s2777_s15 }
 0x63d   : > { %p2780_p6 = pneg %p2779_p10  ;;  %p2786_p5 = por %p2785_p0, %p2784_p8 }
 0x63f   : > { %p2787_p12 = pnand %p2786_p5, %p2780_p6 }
 0x6fb   : > { %v2035_v33 = vpop.f32.mrb[8].mxu0 }
 0x6fc   : > { %v2036_v8 = vadd.f32 %v2302_v32, %v2035_v33  ;;  %v2429_v34 = vpop.f32.mrb[9].mxu0 }
 0x6fe   : > { %2039 = vst.msk [vmem:[%s443_s20] sm:$0xff] %vm465_vm1, %v2036_v8 }
 0x6ff   : > { %2790 = shalt.err (!%p2787_p12)
}
 0x700   : > { %s2791_s3 = scalar_lea.hbm %s3411_s27, 128  ;;  %s2795_s13 = scalar_lea.hbm %s3468_s7, 256 }
 0x701   : > { %p2792_p7 = scmp.ne.s32.totalorder %s3411_s27, %s2791_s3  ;;  %p2796_p2 = scmp.lt.u32.totalorder %s3411_s27, %s3468_s7 }
 0x702   : > { %p2797_p1 = scmp.lt.u32.totalorder %s2795_s13, %s2791_s3  ;;  %p2799_p11 = scmp.lt.u32.totalorder %s2791_s3, %s3411_s27 }
 0x703   : > { %p2793_p13 = pnand %p2792_p7, %p3523_p4 }
 0x704   : > { %p2798_p3 = por %p2797_p1, %p2796_p2 }
 0x705   : > { %p2794_p9 = pneg %p2793_p13 }
 0x706   : > { %p2800_p10 = por %p2799_p11, %p2798_p3 }
 0x708   : > { %p2801_p6 = pnand %p2800_p10, %p2794_p9 }
 0x70a   : > { %2804 = shalt.err (!%p2801_p6)
}
 0x70b   : > { %2468 = dma.vmem_to_hbm [thread:$0]  (%p3523_p4), %s3413_s9, 128, %s3411_s27, %s2050_s10  }
 0x70c PF: > { %s3524_s14 = sld [smem:[#allocation19_spill]]  ;;  %s3525_s23 = sld [smem:[#allocation22_spill]] }
 0x70d   : > { %s3526_s18 = sld [smem:[#allocation21_spill]] }
 0x712   : > { %s2095_s12 = sand.u32 1, %s3524_s14   ;;  %p3527_p8 = scmp.ne.s32.totalorder %s3525_s23, 0 }
 0x713   : > { %p3528_p0 = scmp.ge.s32.totalorder %s3526_s18, 2  ;;  %s2096_s26 = scalar_lea.sflag [#allocation4], %s2095_s12 }
 0x715   : > { %p2490_p5 = pnand %p3528_p0, %p3527_p8 }
 0x717   : > { %2842 = dma.done.wait (!%p2490_p5), %s2096_s26, 128  }
 0x718   : > { %2844 = vsyncadd (!%p2490_p5), %s2096_s26, 4294967168  ;;  %s2105_s17 = scalar_lea.sflag [#allocation13], %s2095_s12 }
 0x719   : > { %2846 = dma.done.wait (!%p2490_p5), %s2105_s17, 128  }
 0x71a   : > { %2848 = vsyncadd (!%p2490_p5), %s2105_s17, 4294967168  ;;  %s32_s10 = sadd.s32 1, %s3526_s18   ;;  %s3529_s24 = sld [smem:[#allocation24_spill]] }
 0x71b   : > { %p29_p12 = scmp.ge.s32.totalorder %s32_s10, 4   ;;  %s3530_s30 = sld [smem:[#allocation20_spill]] }
 0x71c   : > { %s3531_s9 = sld [smem:[#allocation23_spill]]  ;;  %s3532_s27 = smov %s2855_s28 }
 0x71d   : > { %s3533_s28 = smov %s2859_s29  ;;  %31 = sbr.rel (!%p29_p12) target bundleno = 15 (0xf), region = 142 }
 0x720   : > { %s3534_s29 = smov %s3529_s24 }
 0x724   :  { %2110 = vsyncpa [#allocation3], 1 }
 0x725   :  { %2112 = vsyncpa [#allocation3 + $0x1], 1 }
 0x726   :  { %2113 = vsyncpa [#allocation6], 1 }
 0x727   :  { %2115 = vsyncpa [#allocation6 + $0x1], 1 }
 0x728   :  { %2116 = vsyncpa [#allocation9], 1 }
 0x729   :  { %2117 = vsyncpa [#allocation4], 1 }
 0x72a   :  { %2119 = vsyncpa [#allocation4 + $0x1], 1 }
 0x72b   :  { %2120 = vsyncpa [#allocation13], 1 }
 0x72c   :  { %2122 = vsyncpa [#allocation13 + $0x1], 1 }

</bundles_post_ra>
